<compile_context>
chip_gen: v5e
topology: v5e:2x2
jax: 0.10.0
libtpu: 0.0.40
codegen_flags: <defaults>
</compile_context>

<pallas_src>
import jax
import jax.numpy as jnp
from jax.experimental import pallas as pl
from jax.experimental.pallas import tpu as pltpu


def _fused_conv1x1_sigmoid_kernel(x_ref, w_ref, b_ref, o_ref):
    """Fused channel mix + sigmoid.

    x_ref / o_ref: (N, C, TR, 128) VMEM tiles (pixels on the last two axes,
    vreg-dense), or (N, C, P) in the odd-spatial fallback.
    w_ref: (C, C) and b_ref: (C,) in SMEM; scalar reads feed VPU FMAs.
    """
    C = x_ref.shape[1]
    # Per-input-channel dense slabs (full-vreg views, no sublane padding).
    xs = [x_ref[:, ci] for ci in range(C)]

    # Unrolled C*C scalar*vector FMAs on the VPU.  Fine for small C; for
    # C >~ 32 this should switch to an MXU matmul (pixels on M, channels K/N).
    for co in range(C):
        acc = b_ref[co] + w_ref[co, 0] * xs[0]
        for ci in range(1, C):
            acc = acc + w_ref[co, ci] * xs[ci]
        # Sigmoid's transcendental rides the EUP slot; store each output
        # channel directly as it is produced (dense unmasked vst, no
        # jnp.stack sublane relayout, shorter live ranges).
        o_ref[:, co] = jax.nn.sigmoid(acc).astype(o_ref.dtype)


def _choose_tile_rows(n, c, rows):
    """Rows (of 128 lanes) per block: multiple of 8, a few MiB per buffer."""
    bytes_per_row = n * c * 128 * 4  # f32
    # ~4 MiB per input block amortizes the ~0.35us/step overhead and keeps
    # double-buffered in+out buffers far below the v7x 32 MiB scoped limit.
    target = max(8, ((4 << 20) // bytes_per_row) // 8 * 8)
    if rows <= target:
        return rows  # whole array in one block (full-dim block is always legal)
    # Large problem: guarantee >= 2 grid steps so both v7x TensorCores get work.
    half = max(8, (rows // 2) // 8 * 8)
    return min(target, half)


@jax.jit
def sample_module3_forward(x_nchw, w0, b0, w1, b1):
    """SampleModule3 forward: sigmoid(conv1x1(conv1x1(x, w0, b0), w1, b1)).

    x_nchw: (N, C, H, W) f32;  w0/w1: (C, C, 1, 1);  b0/b1: (C,).
    """
    N, C, H, W = x_nchw.shape
    P = H * W

    # Fuse the two linear 1x1 convs (no nonlinearity between them).
    w0m = w0.reshape(C, C)
    w1m = w1.reshape(C, C)
    w = w1m @ w0m            # (C, C)
    b = w1m @ b0 + b1        # (C,)

    smem_spec = pl.BlockSpec(memory_space=pltpu.MemorySpace.SMEM)

    if P % 128 == 0:
        rows = P // 128
        x = x_nchw.reshape(N, C, rows, 128)       # free reshape, lane-dense
        tile_rows = _choose_tile_rows(N, C, rows)
        grid_len = pl.cdiv(rows, tile_rows)
        block_spec = pl.BlockSpec((N, C, tile_rows, 128), lambda j: (0, 0, j, 0))
        out_shape = jax.ShapeDtypeStruct((N, C, rows, 128), x.dtype)
    else:
        # Fallback for odd H*W: single full-dim block with the pixel axis on
        # lanes (legal even when not a multiple of 128; stores are lane-masked).
        x = x_nchw.reshape(N, C, P)
        grid_len = 1
        block_spec = pl.BlockSpec((N, C, P), lambda j: (0, 0, 0))
        out_shape = jax.ShapeDtypeStruct((N, C, P), x.dtype)

    out = pl.pallas_call(
        _fused_conv1x1_sigmoid_kernel,
        out_shape=out_shape,
        grid=(grid_len,),
        in_specs=[block_spec, smem_spec, smem_spec],
        out_specs=block_spec,
        compiler_params=pltpu.CompilerParams(
            dimension_semantics=(("parallel",) if grid_len > 1 else ("arbitrary",)),
        ),
    )(x, w, b)

    return out.reshape(N, C, H, W)


def _init_conv_params(key, c):
    # Deterministic init mimicking Conv2d default (uniform in +/- 1/sqrt(fan_in)).
    kw, kb = jax.random.split(key)
    bound = 1.0 / jnp.sqrt(jnp.float32(c))  # fan_in = c * 1 * 1
    w = jax.random.uniform(kw, (c, c, 1, 1), jnp.float32, -bound, bound)
    b = jax.random.uniform(kb, (c,), jnp.float32, -bound, bound)
    return w, b


def _reference(x, w0, b0, w1, b1):
    # Pure-JAX, un-fused two-layer reference of the original module's math.
    N, C, H, W = x.shape
    w0m = w0.reshape(C, C)
    w1m = w1.reshape(C, C)
    h = jnp.sum(w0m[None, :, :, None, None] * x[:, None, :, :, :], axis=2) \
        + b0.reshape(1, C, 1, 1)
    y = jnp.sum(w1m[None, :, :, None, None] * h[:, None, :, :, :], axis=2) \
        + b1.reshape(1, C, 1, 1)
    return jax.nn.sigmoid(y)


if __name__ == "__main__":
    key = jax.random.PRNGKey(0)
    kx, k0, k1 = jax.random.split(key, 3)

    # Small shapes: batch=2, num_features (channels)=4, spatial=16x16.
    N, C, H, W = 2, 4, 16, 16
    x = jax.random.normal(kx, (N, C, H, W), jnp.float32)

    w0, b0 = _init_conv_params(k0, C)
    w1, b1 = _init_conv_params(k1, C)

    out = jax.block_until_ready(sample_module3_forward(x, w0, b0, w1, b1))

    ref = _reference(x, w0, b0, w1, b1)
    assert out.shape == (N, C, H, W)
    assert jnp.allclose(out, ref, atol=1e-5, rtol=1e-5)

    print("KERNEL_OK")
</pallas_src>

<mosaic_0001>
module attributes {stable_mosaic.version = 11 : i64} {
  func.func @_fused_conv1x1_sigmoid_kernel(%arg0: i32, %arg1: memref<2x4x2x128xf32, #tpu.memory_space<vmem>>, %arg2: memref<4x4xf32, #tpu.memory_space<smem>>, %arg3: memref<4xf32, #tpu.memory_space<smem>>, %arg4: memref<2x4x2x128xf32, #tpu.memory_space<vmem>>) attributes {dimension_semantics = [#tpu.dimension_semantics<arbitrary>], iteration_bounds = array<i64: 1>, scalar_prefetch = 0 : i64, scratch_operands = 0 : i64, tpu.core_type = #tpu.core_type<tc>, window_params = [{transform_indices = @transform_0, window_bounds = array<i64: 2, 4, 2, 128>}, {transform_indices = @transform_1, window_bounds = array<i64: 4, 4>}, {transform_indices = @transform_2, window_bounds = array<i64: 4>}, {transform_indices = @transform_3, window_bounds = array<i64: 2, 4, 2, 128>}]} {
    %c0 = arith.constant 0 : index
    %c0_0 = arith.constant 0 : index
    %c0_1 = arith.constant 0 : index
    %c0_2 = arith.constant 0 : index
    %0 = vector.load %arg1[%c0, %c0_0, %c0_1, %c0_2] : memref<2x4x2x128xf32, #tpu.memory_space<vmem>>, vector<2x1x2x128xf32>
    %1 = vector.shape_cast %0 : vector<2x1x2x128xf32> to vector<2x2x128xf32>
    %c0_3 = arith.constant 0 : index
    %c1 = arith.constant 1 : index
    %c0_4 = arith.constant 0 : index
    %c0_5 = arith.constant 0 : index
    %2 = vector.load %arg1[%c0_3, %c1, %c0_4, %c0_5] : memref<2x4x2x128xf32, #tpu.memory_space<vmem>>, vector<2x1x2x128xf32>
    %3 = vector.shape_cast %2 : vector<2x1x2x128xf32> to vector<2x2x128xf32>
    %c0_6 = arith.constant 0 : index
    %c2 = arith.constant 2 : index
    %c0_7 = arith.constant 0 : index
    %c0_8 = arith.constant 0 : index
    %4 = vector.load %arg1[%c0_6, %c2, %c0_7, %c0_8] : memref<2x4x2x128xf32, #tpu.memory_space<vmem>>, vector<2x1x2x128xf32>
    %5 = vector.shape_cast %4 : vector<2x1x2x128xf32> to vector<2x2x128xf32>
    %c0_9 = arith.constant 0 : index
    %c3 = arith.constant 3 : index
    %c0_10 = arith.constant 0 : index
    %c0_11 = arith.constant 0 : index
    %6 = vector.load %arg1[%c0_9, %c3, %c0_10, %c0_11] : memref<2x4x2x128xf32, #tpu.memory_space<vmem>>, vector<2x1x2x128xf32>
    %7 = vector.shape_cast %6 : vector<2x1x2x128xf32> to vector<2x2x128xf32>
    %c0_12 = arith.constant 0 : index
    %8 = memref.load %arg3[%c0_12] : memref<4xf32, #tpu.memory_space<smem>>
    %c0_13 = arith.constant 0 : index
    %c0_14 = arith.constant 0 : index
    %9 = memref.load %arg2[%c0_13, %c0_14] : memref<4x4xf32, #tpu.memory_space<smem>>
    %10 = vector.broadcast %9 : f32 to vector<2x2x128xf32>
    %11 = arith.mulf %10, %1 : vector<2x2x128xf32>
    %12 = vector.broadcast %8 : f32 to vector<2x2x128xf32>
    %13 = arith.addf %12, %11 : vector<2x2x128xf32>
    %c0_15 = arith.constant 0 : index
    %c1_16 = arith.constant 1 : index
    %14 = memref.load %arg2[%c0_15, %c1_16] : memref<4x4xf32, #tpu.memory_space<smem>>
    %15 = vector.broadcast %14 : f32 to vector<2x2x128xf32>
    %16 = arith.mulf %15, %3 : vector<2x2x128xf32>
    %17 = arith.addf %13, %16 : vector<2x2x128xf32>
    %c0_17 = arith.constant 0 : index
    %c2_18 = arith.constant 2 : index
    %18 = memref.load %arg2[%c0_17, %c2_18] : memref<4x4xf32, #tpu.memory_space<smem>>
    %19 = vector.broadcast %18 : f32 to vector<2x2x128xf32>
    %20 = arith.mulf %19, %5 : vector<2x2x128xf32>
    %21 = arith.addf %17, %20 : vector<2x2x128xf32>
    %c0_19 = arith.constant 0 : index
    %c3_20 = arith.constant 3 : index
    %22 = memref.load %arg2[%c0_19, %c3_20] : memref<4x4xf32, #tpu.memory_space<smem>>
    %23 = vector.broadcast %22 : f32 to vector<2x2x128xf32>
    %24 = arith.mulf %23, %7 : vector<2x2x128xf32>
    %25 = arith.addf %21, %24 : vector<2x2x128xf32>
    %26 = arith.negf %25 : vector<2x2x128xf32>
    %27 = math.exp %26 : vector<2x2x128xf32>
    %cst = arith.constant 1.000000e+00 : f32
    %28 = vector.broadcast %cst : f32 to vector<2x2x128xf32>
    %29 = arith.addf %28, %27 : vector<2x2x128xf32>
    %30 = arith.divf %28, %29 : vector<2x2x128xf32>
    %c0_21 = arith.constant 0 : index
    %c0_22 = arith.constant 0 : index
    %c0_23 = arith.constant 0 : index
    %c0_24 = arith.constant 0 : index
    %31 = vector.load %arg4[%c0_21, %c0_22, %c0_23, %c0_24] : memref<2x4x2x128xf32, #tpu.memory_space<vmem>>, vector<2x1x2x128xf32>
    %32 = vector.shape_cast %31 : vector<2x1x2x128xf32> to vector<2x2x128xf32>
    %33 = vector.shape_cast %30 : vector<2x2x128xf32> to vector<2x1x2x128xf32>
    tpu.vector_store %arg4[%c0_21, %c0_22, %c0_23, %c0_24], %33 {strides = array<i32>} : memref<2x4x2x128xf32, #tpu.memory_space<vmem>>, vector<2x1x2x128xf32>,
    %c1_25 = arith.constant 1 : index
    %34 = memref.load %arg3[%c1_25] : memref<4xf32, #tpu.memory_space<smem>>
    %c1_26 = arith.constant 1 : index
    %c0_27 = arith.constant 0 : index
    %35 = memref.load %arg2[%c1_26, %c0_27] : memref<4x4xf32, #tpu.memory_space<smem>>
    %36 = vector.broadcast %35 : f32 to vector<2x2x128xf32>
    %37 = arith.mulf %36, %1 : vector<2x2x128xf32>
    %38 = vector.broadcast %34 : f32 to vector<2x2x128xf32>
    %39 = arith.addf %38, %37 : vector<2x2x128xf32>
    %c1_28 = arith.constant 1 : index
    %c1_29 = arith.constant 1 : index
    %40 = memref.load %arg2[%c1_28, %c1_29] : memref<4x4xf32, #tpu.memory_space<smem>>
    %41 = vector.broadcast %40 : f32 to vector<2x2x128xf32>
    %42 = arith.mulf %41, %3 : vector<2x2x128xf32>
    %43 = arith.addf %39, %42 : vector<2x2x128xf32>
    %c1_30 = arith.constant 1 : index
    %c2_31 = arith.constant 2 : index
    %44 = memref.load %arg2[%c1_30, %c2_31] : memref<4x4xf32, #tpu.memory_space<smem>>
    %45 = vector.broadcast %44 : f32 to vector<2x2x128xf32>
    %46 = arith.mulf %45, %5 : vector<2x2x128xf32>
    %47 = arith.addf %43, %46 : vector<2x2x128xf32>
    %c1_32 = arith.constant 1 : index
    %c3_33 = arith.constant 3 : index
    %48 = memref.load %arg2[%c1_32, %c3_33] : memref<4x4xf32, #tpu.memory_space<smem>>
    %49 = vector.broadcast %48 : f32 to vector<2x2x128xf32>
    %50 = arith.mulf %49, %7 : vector<2x2x128xf32>
    %51 = arith.addf %47, %50 : vector<2x2x128xf32>
    %52 = arith.negf %51 : vector<2x2x128xf32>
    %53 = math.exp %52 : vector<2x2x128xf32>
    %cst_34 = arith.constant 1.000000e+00 : f32
    %54 = vector.broadcast %cst_34 : f32 to vector<2x2x128xf32>
    %55 = arith.addf %54, %53 : vector<2x2x128xf32>
    %56 = arith.divf %54, %55 : vector<2x2x128xf32>
    %c0_35 = arith.constant 0 : index
    %c1_36 = arith.constant 1 : index
    %c0_37 = arith.constant 0 : index
    %c0_38 = arith.constant 0 : index
    %57 = vector.load %arg4[%c0_35, %c1_36, %c0_37, %c0_38] : memref<2x4x2x128xf32, #tpu.memory_space<vmem>>, vector<2x1x2x128xf32>
    %58 = vector.shape_cast %57 : vector<2x1x2x128xf32> to vector<2x2x128xf32>
    %59 = vector.shape_cast %56 : vector<2x2x128xf32> to vector<2x1x2x128xf32>
    tpu.vector_store %arg4[%c0_35, %c1_36, %c0_37, %c0_38], %59 {strides = array<i32>} : memref<2x4x2x128xf32, #tpu.memory_space<vmem>>, vector<2x1x2x128xf32>,
    %c2_39 = arith.constant 2 : index
    %60 = memref.load %arg3[%c2_39] : memref<4xf32, #tpu.memory_space<smem>>
    %c2_40 = arith.constant 2 : index
    %c0_41 = arith.constant 0 : index
    %61 = memref.load %arg2[%c2_40, %c0_41] : memref<4x4xf32, #tpu.memory_space<smem>>
    %62 = vector.broadcast %61 : f32 to vector<2x2x128xf32>
    %63 = arith.mulf %62, %1 : vector<2x2x128xf32>
    %64 = vector.broadcast %60 : f32 to vector<2x2x128xf32>
    %65 = arith.addf %64, %63 : vector<2x2x128xf32>
    %c2_42 = arith.constant 2 : index
    %c1_43 = arith.constant 1 : index
    %66 = memref.load %arg2[%c2_42, %c1_43] : memref<4x4xf32, #tpu.memory_space<smem>>
    %67 = vector.broadcast %66 : f32 to vector<2x2x128xf32>
    %68 = arith.mulf %67, %3 : vector<2x2x128xf32>
    %69 = arith.addf %65, %68 : vector<2x2x128xf32>
    %c2_44 = arith.constant 2 : index
    %c2_45 = arith.constant 2 : index
    %70 = memref.load %arg2[%c2_44, %c2_45] : memref<4x4xf32, #tpu.memory_space<smem>>
    %71 = vector.broadcast %70 : f32 to vector<2x2x128xf32>
    %72 = arith.mulf %71, %5 : vector<2x2x128xf32>
    %73 = arith.addf %69, %72 : vector<2x2x128xf32>
    %c2_46 = arith.constant 2 : index
    %c3_47 = arith.constant 3 : index
    %74 = memref.load %arg2[%c2_46, %c3_47] : memref<4x4xf32, #tpu.memory_space<smem>>
    %75 = vector.broadcast %74 : f32 to vector<2x2x128xf32>
    %76 = arith.mulf %75, %7 : vector<2x2x128xf32>
    %77 = arith.addf %73, %76 : vector<2x2x128xf32>
    %78 = arith.negf %77 : vector<2x2x128xf32>
    %79 = math.exp %78 : vector<2x2x128xf32>
    %cst_48 = arith.constant 1.000000e+00 : f32
    %80 = vector.broadcast %cst_48 : f32 to vector<2x2x128xf32>
    %81 = arith.addf %80, %79 : vector<2x2x128xf32>
    %82 = arith.divf %80, %81 : vector<2x2x128xf32>
    %c0_49 = arith.constant 0 : index
    %c2_50 = arith.constant 2 : index
    %c0_51 = arith.constant 0 : index
    %c0_52 = arith.constant 0 : index
    %83 = vector.load %arg4[%c0_49, %c2_50, %c0_51, %c0_52] : memref<2x4x2x128xf32, #tpu.memory_space<vmem>>, vector<2x1x2x128xf32>
    %84 = vector.shape_cast %83 : vector<2x1x2x128xf32> to vector<2x2x128xf32>
    %85 = vector.shape_cast %82 : vector<2x2x128xf32> to vector<2x1x2x128xf32>
    tpu.vector_store %arg4[%c0_49, %c2_50, %c0_51, %c0_52], %85 {strides = array<i32>} : memref<2x4x2x128xf32, #tpu.memory_space<vmem>>, vector<2x1x2x128xf32>,
    %c3_53 = arith.constant 3 : index
    %86 = memref.load %arg3[%c3_53] : memref<4xf32, #tpu.memory_space<smem>>
    %c3_54 = arith.constant 3 : index
    %c0_55 = arith.constant 0 : index
    %87 = memref.load %arg2[%c3_54, %c0_55] : memref<4x4xf32, #tpu.memory_space<smem>>
    %88 = vector.broadcast %87 : f32 to vector<2x2x128xf32>
    %89 = arith.mulf %88, %1 : vector<2x2x128xf32>
    %90 = vector.broadcast %86 : f32 to vector<2x2x128xf32>
    %91 = arith.addf %90, %89 : vector<2x2x128xf32>
    %c3_56 = arith.constant 3 : index
    %c1_57 = arith.constant 1 : index
    %92 = memref.load %arg2[%c3_56, %c1_57] : memref<4x4xf32, #tpu.memory_space<smem>>
    %93 = vector.broadcast %92 : f32 to vector<2x2x128xf32>
    %94 = arith.mulf %93, %3 : vector<2x2x128xf32>
    %95 = arith.addf %91, %94 : vector<2x2x128xf32>
    %c3_58 = arith.constant 3 : index
    %c2_59 = arith.constant 2 : index
    %96 = memref.load %arg2[%c3_58, %c2_59] : memref<4x4xf32, #tpu.memory_space<smem>>
    %97 = vector.broadcast %96 : f32 to vector<2x2x128xf32>
    %98 = arith.mulf %97, %5 : vector<2x2x128xf32>
    %99 = arith.addf %95, %98 : vector<2x2x128xf32>
    %c3_60 = arith.constant 3 : index
    %c3_61 = arith.constant 3 : index
    %100 = memref.load %arg2[%c3_60, %c3_61] : memref<4x4xf32, #tpu.memory_space<smem>>
    %101 = vector.broadcast %100 : f32 to vector<2x2x128xf32>
    %102 = arith.mulf %101, %7 : vector<2x2x128xf32>
    %103 = arith.addf %99, %102 : vector<2x2x128xf32>
    %104 = arith.negf %103 : vector<2x2x128xf32>
    %105 = math.exp %104 : vector<2x2x128xf32>
    %cst_62 = arith.constant 1.000000e+00 : f32
    %106 = vector.broadcast %cst_62 : f32 to vector<2x2x128xf32>
    %107 = arith.addf %106, %105 : vector<2x2x128xf32>
    %108 = arith.divf %106, %107 : vector<2x2x128xf32>
    %c0_63 = arith.constant 0 : index
    %c3_64 = arith.constant 3 : index
    %c0_65 = arith.constant 0 : index
    %c0_66 = arith.constant 0 : index
    %109 = vector.load %arg4[%c0_63, %c3_64, %c0_65, %c0_66] : memref<2x4x2x128xf32, #tpu.memory_space<vmem>>, vector<2x1x2x128xf32>
    %110 = vector.shape_cast %109 : vector<2x1x2x128xf32> to vector<2x2x128xf32>
    %111 = vector.shape_cast %108 : vector<2x2x128xf32> to vector<2x1x2x128xf32>
    tpu.vector_store %arg4[%c0_63, %c3_64, %c0_65, %c0_66], %111 {strides = array<i32>} : memref<2x4x2x128xf32, #tpu.memory_space<vmem>>, vector<2x1x2x128xf32>,
    return
  }
  func.func @transform_0(%arg0: i32) -> (i32, i32, i32, i32) {
    %c0_i32 = arith.constant 0 : i32
    %c0_i32_0 = arith.constant 0 : i32
    %c0_i32_1 = arith.constant 0 : i32
    %c0_i32_2 = arith.constant 0 : i32
    return %c0_i32, %c0_i32_0, %arg0, %c0_i32_1 : i32, i32, i32, i32
  }
  func.func @transform_1(%arg0: i32) -> (i32, i32) {
    %c0_i32 = arith.constant 0 : i32
    %c0_i32_0 = arith.constant 0 : i32
    %c0_i32_1 = arith.constant 0 : i32
    return %c0_i32, %c0_i32_0 : i32, i32
  }
  func.func @transform_2(%arg0: i32) -> i32 {
    %c0_i32 = arith.constant 0 : i32
    %c0_i32_0 = arith.constant 0 : i32
    return %c0_i32 : i32
  }
  func.func @transform_3(%arg0: i32) -> (i32, i32, i32, i32) {
    %c0_i32 = arith.constant 0 : i32
    %c0_i32_0 = arith.constant 0 : i32
    %c0_i32_1 = arith.constant 0 : i32
    %c0_i32_2 = arith.constant 0 : i32
    return %c0_i32, %c0_i32_0, %arg0, %c0_i32_1 : i32, i32, i32, i32
  }
}

</mosaic_0001>

<bundles_post_ra>
// kernel: sample_module3_forward.1
= control target key start
LH: loop header
LB: loop body
LE: loop exit
PB: predicated region body
PF: predicated region fallthrough
CT: control target
= control target key end

     0   :  { %8 = vsyncpa [#allocation3], 0  ;;  %s680_s0 = inlined_call_operand.vmem [shape: f32[2,4,2,128], index: 0, kind: input, shape index: {}]   ;;  %s681_s1 = inlined_call_operand.vmem [shape: f32[4,4], index: 1, kind: input, shape index: {}]   ;;  %s682_s2 = inlined_call_operand.vmem [shape: f32[4], index: 2, kind: input, shape index: {}]   ;;  %s683_s3 = inlined_call_operand.vmem [shape: f32[2,4,2,128], index: 3, kind: output, shape index: {}]  }
   0x1   :  { %s17_s14 = sshll.u32 %s681_s1, 4  ;;  %s18_s14 = int_to_ptr.vmem [resolvable:$true] %s17_s14 }
   0x2   :  { %9 = vsyncpa [#allocation5], 0  ;;  %s26_s17 = sshll.u32 %s682_s2, 4  ;;  %s423_s18 = smov [#allocation2]   ;;  %s27_s17 = int_to_ptr.vmem [resolvable:$true] %s26_s17 }
   0x3   :  { %20 = dma.vmem_to_smem %s18_s14, 64, %s423_s18, [#allocation3]  }
   0x4   :  { %s424_s19 = smov [#allocation4]  }
   0x5   :  { %29 = dma.vmem_to_smem %s27_s17, 16, %s424_s19, [#allocation5]  }
   0x6   :  { %419 = dma.done.wait [#allocation3], 64  }
   0x7   :  { %420 = vsyncadd [#allocation3], 4294967232 }
   0x8   :  { %421 = dma.done.wait [#allocation5], 16  }
   0x9   :  { %422 = vsyncadd [#allocation5], 4294967280 }
   0xa   :  { %38 = sfence }
   0xb   :  { %s50_s20 = sld [smem:[#allocation4]]  ;;  %v454_v0 = vld [vmem:[%s680_s0] sm:$0x3]  ;;  %v459_v1 = vld [vmem:[%s680_s0 + $0x8] sm:$0x3] }
   0xc   :  { %s51_s21 = sld [smem:[#allocation2]]  ;;  %v466_v2 = vld [vmem:[%s680_s0 + $0x2] sm:$0x3]  ;;  %v471_v3 = vld [vmem:[%s680_s0 + $0xa] sm:$0x3] }
   0xd   :  { %s329_s22 = sld [smem:[#allocation2 + $0x1]]  ;;  %v478_v4 = vld [vmem:[%s680_s0 + $0x4] sm:$0x3]  ;;  %v483_v5 = vld [vmem:[%s680_s0 + $0x6] sm:$0x3] }
   0xe   :  { %s330_s1 = sld [smem:[#allocation2 + $0x2]]  ;;  %v491_v10 = vld [vmem:[%s680_s0 + $0xc] sm:$0x3]  ;;  %v496_v11 = vld [vmem:[%s680_s0 + $0xe] sm:$0x3] }
   0xf   :  { %s331_s23 = sld [smem:[#allocation2 + $0x3]] }
  0x10   :  { %s461_s27 = sld [smem:[#allocation4 + $0x1]] }
  0x11   :  { %s473_s5 = sld [smem:[#allocation2 + $0x80]]  ;;  %v55_v7 = vstv %s50_s20 }
  0x12   :  { %v52_v6 = vstv %s51_s21  ;;  %s485_s10 = sld [smem:[#allocation2 + $0x81]] }
  0x13   :  { %v53_v8 = vmul.f32 %v52_v6, %v454_v0  ;;  %v59_v9 = vstv %s329_s22  ;;  %v54_v12 = vmul.f32 %v52_v6, %v459_v1  ;;  %s499_s15 = sld [smem:[#allocation2 + $0x82]] }
  0x14   :  { %v60_v13 = vmul.f32 %v466_v2, %v59_v9  ;;  %v65_v14 = vstv %s330_s1  ;;  %v61_v15 = vmul.f32 %v471_v3, %v59_v9  ;;  %s503_s16 = sld [smem:[#allocation2 + $0x83]] }
  0x15   :  { %v56_v16 = vadd.f32 %v55_v7, %v53_v8  ;;  %v66_v17 = vmul.f32 %v478_v4, %v65_v14  ;;  %v71_v18 = vstv %s331_s23  ;;  %v57_v19 = vadd.f32 %v55_v7, %v54_v12  ;;  %s506_s0 = sld [smem:[#allocation4 + $0x2]] }
  0x16   :  { %v72_v20 = vmul.f32 %v483_v5, %v71_v18  ;;  %v67_v21 = vmul.f32 %v491_v10, %v65_v14  ;;  %v73_v22 = vmul.f32 %v496_v11, %v71_v18  ;;  %s511_s17 = sld [smem:[#allocation2 + $0x100]]  ;;  %v121_v26 = vstv %s461_s27 }
  0x17   :  { %v62_v23 = vadd.f32 %v60_v13, %v56_v16  ;;  %v63_v24 = vadd.f32 %v61_v15, %v57_v19  ;;  %v118_v25 = vstv %s473_s5  ;;  %s515_s18 = sld [smem:[#allocation2 + $0x101]] }
  0x18   :  { %v119_v27 = vmul.f32 %v118_v25, %v454_v0  ;;  %v125_v28 = vstv %s485_s10  ;;  %v120_v29 = vmul.f32 %v118_v25, %v459_v1  ;;  %s520_s19 = sld [smem:[#allocation2 + $0x102]] }
  0x19   :  { %v68_v30 = vadd.f32 %v66_v17, %v62_v23  ;;  %v69_v31 = vadd.f32 %v67_v21, %v63_v24  ;;  %v126_v32 = vmul.f32 %v466_v2, %v125_v28  ;;  %v131_v33 = vstv %s499_s15  ;;  %s524_s20 = sld [smem:[#allocation2 + $0x103]] }
  0x1a   :  { %v122_v34 = vadd.f32 %v121_v26, %v119_v27  ;;  %v132_v35 = vmul.f32 %v478_v4, %v131_v33  ;;  %v137_v36 = vstv %s503_s16  ;;  %v123_v37 = vadd.f32 %v121_v26, %v120_v29  ;;  %s530_s21 = sld [smem:[#allocation2 + $0x180]] }
  0x1b   :  { %v74_v38 = vadd.f32 %v72_v20, %v68_v30  ;;  %v75_v39 = vadd.f32 %v73_v22, %v69_v31  ;;  %v138_v40 = vmul.f32 %v483_v5, %v137_v36  ;;  %v127_v41 = vmul.f32 %v471_v3, %v125_v28  ;;  %s536_s22 = sld [smem:[#allocation2 + $0x181]] }
  0x1c   :  { %v128_v42 = vadd.f32 %v126_v32, %v122_v34  ;;  %v133_v43 = vmul.f32 %v491_v10, %v131_v33  ;;  %v139_v44 = vmul.f32 %v496_v11, %v137_v36  ;;  %v185_v45 = vstv %s511_s17  ;;  %s542_s1 = sld [smem:[#allocation4 + $0x3]] }
  0x1d   :  { %v332_v46 = vmul.f32 -1.442695, %v74_v38  ;;  %v333_v47 = vmul.f32 -1.442695, %v75_v39  ;;  %v129_v48 = vadd.f32 %v127_v41, %v123_v37  ;;  %v186_v49 = vmul.f32 %v185_v45, %v454_v0  ;;  %s546_s23 = sld [smem:[#allocation2 + $0x182]] }
  0x1e   :  { %v134_v50 = vadd.f32 %v132_v35, %v128_v42  ;;  %v188_v51 = vstv %s506_s0  ;;  %v192_v52 = vstv %s515_s18  ;;  %v198_v53 = vstv %s520_s19  ;;  %s553_s24 = sld [smem:[#allocation2 + $0x183]] }
  0x1f   :  { %363 = vpow2.f32 %v332_v46  ;;  %v135_v54 = vadd.f32 %v133_v43, %v129_v48  ;;  %v189_v55 = vadd.f32 %v188_v51, %v186_v49  ;;  %v193_v56 = vmul.f32 %v466_v2, %v192_v52 }
  0x20   :  { %365 = vpow2.f32 %v333_v47  ;;  %v140_v57 = vadd.f32 %v138_v40, %v134_v50  ;;  %v199_v58 = vmul.f32 %v478_v4, %v198_v53  ;;  %v204_v59 = vstv %s524_s20 }
  0x21   :  { %v141_v60 = vadd.f32 %v139_v44, %v135_v54  ;;  %v195_v61 = vadd.f32 %v193_v56, %v189_v55  ;;  %v205_v62 = vmul.f32 %v483_v5, %v204_v59  ;;  %v187_v63 = vmul.f32 %v185_v45, %v459_v1 }
  0x22   :  { %v339_v6 = vmul.f32 -1.442695, %v140_v57  ;;  %v194_v7 = vmul.f32 %v471_v3, %v192_v52  ;;  %v200_v8 = vmul.f32 %v491_v10, %v198_v53  ;;  %v252_v14 = vstv %s530_s21 }
  0x23   :  { %v340_v9 = vmul.f32 -1.442695, %v141_v60  ;;  %v201_v12 = vadd.f32 %v199_v58, %v195_v61  ;;  %v190_v13 = vadd.f32 %v188_v51, %v187_v63  ;;  %v259_v18 = vstv %s536_s22 }
  0x24   :  { %367 = vpow2.f32 %v339_v6  ;;  %v206_v21 = vmul.f32 %v496_v11, %v204_v59  ;;  %v253_v22 = vmul.f32 %v252_v14, %v454_v0  ;;  %v255_v26 = vstv %s542_s1 }
  0x25   :  { %v364_v15 = vpop.eup %363  ;;  %369 = vpow2.f32 %v340_v9  ;;  %v207_v16 = vadd.f32 %v205_v62, %v201_v12  ;;  %v196_v17 = vadd.f32 %v194_v7, %v190_v13  ;;  %v260_v27 = vmul.f32 %v466_v2, %v259_v18 }
  0x26   :  { %v366_v19 = vpop.eup %365  ;;  %v82_v20 = vadd.f32 1.0, %v364_v15  ;;  %v265_v28 = vstv %s546_s23  ;;  %v256_v34 = vadd.f32 %v255_v26, %v253_v22  ;;  %v271_v37 = vstv %s553_s24 }
  0x27   :  { %v558_v23 = vadd.f32 1.0, %v366_v19  ;;  %v348_v24 = vmul.f32 -1.442695, %v207_v16  ;;  %v202_v25 = vadd.f32 %v200_v8, %v196_v17  ;;  %v266_v38 = vmul.f32 %v478_v4, %v265_v28 }
  0x28   :  { %371 = vrcp.f32 %v82_v20  ;;  %v93_v29 = vand.u32 2147483647, %v82_v20  ;;  %v95_v30 = vand.u32 2147483648, %v82_v20  ;;  %vm89_vm0 = vweird.f32 %v82_v20 }
  0x29   :  { %373 = vrcp.f32 %v558_v23  ;;  %v110_v31 = vand.u32 2147483648, %v558_v23  ;;  %v108_v33 = vand.u32 2147483647, %v558_v23  ;;  %v208_v0 = vadd.f32 %v206_v21, %v202_v25 }
  0x2a   :  { %v368_v32 = vpop.eup %367  ;;  %375 = vpow2.f32 %v348_v24  ;;  %vm104_vm1 = vweird.f32 %v558_v23  ;;  %vm573_vm2 = vcmp.eq.f32.partialorder %v93_v29, 8.507059e+37  ;;  %v96_v40 = vor.u32 1.1754944e-38, %v95_v30 }
  0x2b   :  { %v370_v35 = vpop.eup %369  ;;  %v566_v36 = vadd.f32 1.0, %v368_v32  ;;  %v111_v41 = vor.u32 1.1754944e-38, %v110_v31  ;;  %v349_v42 = vmul.f32 -1.442695, %v208_v0  ;;  %vm578_vm3 = vcmp.eq.f32.partialorder %v108_v33, 8.507059e+37 }
  0x2c   :  { %v570_v2 = vadd.f32 1.0, %v370_v35  ;;  %v262_v4 = vadd.f32 %v260_v27, %v256_v34  ;;  %v272_v49 = vmul.f32 %v483_v5, %v271_v37  ;;  %v254_v50 = vmul.f32 %v252_v14, %v459_v1 }
  0x2d   :  { %377 = vrcp.f32 %v566_v36  ;;  %v159_v45 = vand.u32 2147483647, %v566_v36  ;;  %v161_v46 = vand.u32 2147483648, %v566_v36  ;;  %vm155_vm4 = vweird.f32 %v566_v36 }
  0x2e   :  { %v372_v43 = vpop.eup %371  ;;  %379 = vrcp.f32 %v570_v2  ;;  %vm170_vm5 = vweird.f32 %v570_v2  ;;  %v174_v53 = vand.u32 2147483647, %v570_v2  ;;  %v176_v54 = vand.u32 2147483648, %v570_v2 }
  0x2f   :  { %v374_v47 = vpop.eup %373  ;;  %v85_v48 = vmul.f32 %v372_v43, %v82_v20  ;;  %vm90_vm6 = vweird.f32 %v372_v43  ;;  %381 = vpow2.f32 %v349_v42  ;;  %vm594_vm8 = vcmp.eq.f32.partialorder %v159_v45, 8.507059e+37 }
  0x30   :  { %v376_v51 = vpop.eup %375  ;;  %v100_v52 = vmul.f32 %v374_v47, %v558_v23  ;;  %vm105_vm7 = vweird.f32 %v374_v47  ;;  %v162_v1 = vor.u32 1.1754944e-38, %v161_v46  ;;  %v268_v58 = vadd.f32 %v266_v38, %v262_v4  ;;  %vm601_vm9 = vmor %vm89_vm0, %vm90_vm6 }
  0x31   :  { %v86_v55 = vsub.f32 1.0, %v85_v48  ;;  %v592_v56 = vadd.f32 1.0, %v376_v51  ;;  %v257_v61 = vadd.f32 %v255_v26, %v254_v50  ;;  %v261_v62 = vmul.f32 %v471_v3, %v259_v18  ;;  %vm613_vm11 = vmor %vm104_vm1, %vm105_vm7 }
  0x32   :  { %v101_v57 = vsub.f32 1.0, %v100_v52  ;;  %vm606_vm10 = vcmp.eq.f32.partialorder %v174_v53, 8.507059e+37  ;;  %v177_v12 = vor.u32 1.1754944e-38, %v176_v54  ;;  %v267_v15 = vmul.f32 %v491_v10, %v265_v28 }
  0x33   :  { %v378_v59 = vpop.eup %377  ;;  %v87_v60 = vmul.f32 %v372_v43, %v86_v55  ;;  %383 = vrcp.f32 %v592_v56  ;;  %v274_v18 = vadd.f32 %v272_v49, %v268_v58  ;;  %v263_v22 = vadd.f32 %v261_v62, %v257_v61 }
  0x34   :  { %v380_v63 = vpop.eup %379  ;;  %v102_v7 = vmul.f32 %v374_v47, %v101_v57  ;;  %v151_v8 = vmul.f32 %v378_v59, %v566_v36  ;;  %vm156_vm12 = vweird.f32 %v378_v59  ;;  %v273_v23 = vmul.f32 %v496_v11, %v271_v37 }
  0x35   :  { %v88_v13 = vadd.f32 %v372_v43, %v87_v60  ;;  %v166_v14 = vmul.f32 %v380_v63, %v570_v2  ;;  %vm171_vm13 = vweird.f32 %v380_v63  ;;  %v382_v19 = vpop.eup %381  ;;  %vm634_vm14 = vmor %vm155_vm4, %vm156_vm12  ;;  %v357_v30 = vmul.f32 -1.442695, %v274_v18 }
  0x36   :  { %v103_v16 = vadd.f32 %v374_v47, %v102_v7  ;;  %v152_v17 = vsub.f32 1.0, %v151_v8  ;;  %v216_v10 = vadd.f32 1.0, %v382_v19  ;;  %v269_v31 = vadd.f32 %v267_v15, %v263_v22  ;;  %vm644_vm15 = vmor %vm170_vm5, %vm171_vm13 }
  0x37   :  { %v92_v20 = vsel %vm601_vm9, %v372_v43, %v88_v13  ;;  %v167_v21 = vsub.f32 1.0, %v166_v14  ;;  %vm222_vm0 = vweird.f32 %v592_v56  ;;  %v226_v35 = vand.u32 2147483647, %v592_v56 }
  0x38   :  { %v97_v24 = vsel %vm573_vm2, %v96_v40, %v92_v20  ;;  %v107_v25 = vsel %vm613_vm11, %v374_v47, %v103_v16  ;;  %v153_v26 = vmul.f32 %v378_v59, %v152_v17  ;;  %385 = vrcp.f32 %v216_v10 }
  0x39   :  { %v384_v27 = vpop.eup %383  ;;  %114 = vst [vmem:[%s683_s3] sm:$0x3] %v97_v24  ;;  %v112_v28 = vsel %vm578_vm3, %v111_v41, %v107_v25  ;;  %v168_v29 = vmul.f32 %v380_v63, %v167_v21  ;;  %v228_v36 = vand.u32 2147483648, %v592_v56  ;;  %387 = vpow2.f32 %v357_v30 }
  0x3a   :  { %115 = vst [vmem:[%s683_s3 + $0x8] sm:$0x3] %v112_v28  ;;  %v154_v32 = vadd.f32 %v378_v59, %v153_v26  ;;  %v218_v0 = vmul.f32 %v384_v27, %v592_v56  ;;  %vm223_vm1 = vweird.f32 %v384_v27  ;;  %v275_v2 = vadd.f32 %v273_v23, %v269_v31 }
  0x3b   :  { %v169_v34 = vadd.f32 %v380_v63, %v168_v29  ;;  %vm224_vm2 = vmor %vm222_vm0, %vm223_vm1  ;;  %v229_v44 = vor.u32 1.1754944e-38, %v228_v36  ;;  %vm227_vm3 = vcmp.eq.f32.partialorder %v226_v35, 8.507059e+37  ;;  %vm237_vm4 = vweird.f32 %v216_v10 }
  0x3c   :  { %v158_v37 = vsel %vm634_vm14, %v378_v59, %v154_v32  ;;  %v219_v38 = vsub.f32 1.0, %v218_v0  ;;  %v358_v43 = vmul.f32 -1.442695, %v275_v2  ;;  %v241_v49 = vand.u32 2147483647, %v216_v10 }
  0x3d   :  { %v163_v39 = vsel %vm594_vm8, %v162_v1, %v158_v37  ;;  %v173_v40 = vsel %vm644_vm15, %v380_v63, %v169_v34  ;;  %v243_v50 = vand.u32 2147483648, %v216_v10 }
  0x3e   :  { %341 = vst [vmem:[%s683_s3 + $0x2] sm:$0x3] %v163_v39  ;;  %v178_v41 = vsel %vm606_vm10, %v177_v12, %v173_v40  ;;  %v220_v42 = vmul.f32 %v384_v27, %v219_v38  ;;  %v386_v45 = vpop.eup %385  ;;  %389 = vpow2.f32 %v358_v43  ;;  %vm242_vm7 = vcmp.eq.f32.partialorder %v241_v49, 8.507059e+37 }
  0x3f   :  { %342 = vst [vmem:[%s683_s3 + $0xa] sm:$0x3] %v178_v41  ;;  %v233_v4 = vmul.f32 %v386_v45, %v216_v10  ;;  %v388_v47 = vpop.eup %387  ;;  %vm238_vm5 = vweird.f32 %v386_v45  ;;  %v244_v56 = vor.u32 1.1754944e-38, %v243_v50 }
  0x40   :  { %v221_v46 = vadd.f32 %v384_v27, %v220_v42  ;;  %v282_v53 = vadd.f32 1.0, %v388_v47  ;;  %vm239_vm6 = vmor %vm237_vm4, %vm238_vm5 }
  0x41   :  { %v234_v52 = vsub.f32 1.0, %v233_v4 }
  0x42   :  { %v225_v48 = vsel %vm224_vm2, %v384_v27, %v221_v46  ;;  %391 = vrcp.f32 %v282_v53  ;;  %v293_v61 = vand.u32 2147483647, %v282_v53  ;;  %v295_v62 = vand.u32 2147483648, %v282_v53 }
  0x43   :  { %v230_v51 = vsel %vm227_vm3, %v229_v44, %v225_v48  ;;  %v235_v54 = vmul.f32 %v386_v45, %v234_v52  ;;  %vm289_vm8 = vweird.f32 %v282_v53 }
  0x44   :  { %350 = vst [vmem:[%s683_s3 + $0x4] sm:$0x3] %v230_v51  ;;  %v390_v55 = vpop.eup %389  ;;  %vm294_vm11 = vcmp.eq.f32.partialorder %v293_v61, 8.507059e+37  ;;  %v296_v9 = vor.u32 1.1754944e-38, %v295_v62 }
  0x45   :  { %v236_v57 = vadd.f32 %v386_v45, %v235_v54  ;;  %v283_v5 = vadd.f32 1.0, %v390_v55 }
  0x47   :  { %v240_v1 = vsel %vm239_vm6, %v386_v45, %v236_v57  ;;  %393 = vrcp.f32 %v283_v5  ;;  %vm304_vm12 = vweird.f32 %v283_v5  ;;  %v310_v12 = vand.u32 2147483648, %v283_v5 }
  0x48   :  { %v245_v58 = vsel %vm242_vm7, %v244_v56, %v240_v1  ;;  %v392_v59 = vpop.eup %391  ;;  %v308_v14 = vand.u32 2147483647, %v283_v5 }
  0x49   :  { %351 = vst [vmem:[%s683_s3 + $0xc] sm:$0x3] %v245_v58  ;;  %v285_v60 = vmul.f32 %v392_v59, %v282_v53  ;;  %vm290_vm9 = vweird.f32 %v392_v59  ;;  %v311_v18 = vor.u32 1.1754944e-38, %v310_v12 }
  0x4a   :  { %vm291_vm10 = vmor %vm289_vm8, %vm290_vm9  ;;  %vm309_vm15 = vcmp.eq.f32.partialorder %v308_v14, 8.507059e+37 }
  0x4b   :  { %v286_v63 = vsub.f32 1.0, %v285_v60 }
  0x4d   :  { %v394_v6 = vpop.eup %393  ;;  %v287_v7 = vmul.f32 %v392_v59, %v286_v63 }
  0x4e   :  { %v300_v8 = vmul.f32 %v394_v6, %v283_v5  ;;  %vm305_vm13 = vweird.f32 %v394_v6 }
  0x4f   :  { %v288_v13 = vadd.f32 %v392_v59, %v287_v7  ;;  %vm306_vm14 = vmor %vm304_vm12, %vm305_vm13 }
  0x50   :  { %v301_v3 = vsub.f32 1.0, %v300_v8 }
  0x51   :  { %v292_v15 = vsel %vm291_vm10, %v392_v59, %v288_v13 }
  0x52   :  { %v302_v16 = vmul.f32 %v394_v6, %v301_v3  ;;  %v297_v17 = vsel %vm294_vm11, %v296_v9, %v292_v15 }
  0x53   :  { %359 = vst [vmem:[%s683_s3 + $0x6] sm:$0x3] %v297_v17 }
  0x54   :  { %v303_v19 = vadd.f32 %v394_v6, %v302_v16 }
  0x56   :  { %v307_v20 = vsel %vm306_vm14, %v394_v6, %v303_v19 }
  0x57   :  { %v312_v21 = vsel %vm309_vm15, %v311_v18, %v307_v20 }
  0x58   :  { %360 = vst [vmem:[%s683_s3 + $0xe] sm:$0x3] %v312_v21 }
  0x59   :  { %321 = vsyncpa [#allocation3], 1 }
  0x5a   :  { %322 = vsyncpa [#allocation5], 1 }

</bundles_post_ra>
